<compile_context>
chip_gen: v7x
topology: tpu7x:2x2x1
jax: 0.10.0
libtpu: 0.0.40
codegen_flags: <defaults>
</compile_context>

<pallas_src>
import functools

import jax
import jax.numpy as jnp
from jax.experimental import pallas as pl
from jax.experimental.pallas import tpu as pltpu


def _round_up(n: int, m: int) -> int:
    return ((n + m - 1) // m) * m


def _cdiv(a: int, b: int) -> int:
    return (a + b - 1) // b


def _embedding_kernel(x_ref, o_ref, *, freq_bands, in_channels, logscale,
                      da_restart, single_store):
    """NeRF embedding on a transposed, lane-dense (channels, batch) tile.

    x_ref : (C, tb)             VMEM, lanes = batch (multiple of 128)
    o_ref : (C*(2*N+1), tb)     VMEM
    Row-block order [x, sin(f0 x), cos(f0 x), sin(f1 x), cos(f1 x), ...] matches
    torch.cat([...], dim=-1) once the wrapper transposes back.
    """
    C = in_channels
    x = x_ref[...].astype(jnp.float32)

    parts = [x]
    s = c = None
    for k, freq in enumerate(freq_bands):                 # static unroll
        if (not logscale) or (k % da_restart == 0):
            # Direct evaluation (restarts the recurrence so rounding error stays ~ulp).
            fx = x if freq == 1.0 else freq * x
            s = jnp.sin(fx)
            c = jnp.cos(fx)
        else:
            # logscale freqs are exactly 2^k: double-angle recurrence, pure VPU mul/add.
            s, c = 2.0 * s * c, (c - s) * (c + s)
        parts.append(s)
        parts.append(c)

    if single_store:
        # One full-block, sublane-aligned store (avoids masked partial-sublane writes).
        o_ref[...] = jnp.concatenate(parts, axis=0).astype(o_ref.dtype)
    else:
        # Fallback: per-slab slice stores.
        for j, p in enumerate(parts):
            o_ref[pl.ds(j * C, C), :] = p.astype(o_ref.dtype)


def make_embedding(in_channels: int, N_freqs: int, logscale: bool = True, *,
                   tile_b: int = 16384, out_dtype=None, da_restart: int = 4,
                   single_store: bool = True, transposed_output: bool = False):
    """Returns x:(B, in_channels) -> (B, in_channels*(2*N_freqs+1)).

    tile_b            : batch rows per grid step (lane axis, rounded to 128); sweep
                        8192-32768 for large B. VMEM use is checked/capped internally.
    out_dtype         : e.g. jnp.bfloat16 to halve output HBM bytes (compute stays f32);
                        defaults to the input dtype (matches the PyTorch module).
    da_restart        : recompute sin/cos directly every `da_restart` octaves (logscale
                        path); bounds double-angle error growth. 1 == always direct.
    single_store      : assemble the full tile and write it with one store (recommended).
    transposed_output : return the (C_out, B) slab (no final transpose) for consumers
                        that can take it, e.g. the first NeRF MLP matmul.
    """
    assert da_restart >= 1
    if logscale:
        freq_bands = tuple(float(2.0 ** k) for k in range(N_freqs))
    else:
        freq_bands = tuple(
            float(v) for v in jnp.linspace(1.0, 2.0 ** (N_freqs - 1), N_freqs))
    C = in_channels
    out_channels = C * (2 * N_freqs + 1)
    kernel = functools.partial(_embedding_kernel, freq_bands=freq_bands, in_channels=C,
                               logscale=bool(logscale), da_restart=da_restart,
                               single_store=single_store)

    def embed(x):
        B, Cx = x.shape
        assert Cx == C, f"expected (B, {C}) input, got {x.shape}"
        dt_out = x.dtype if out_dtype is None else jnp.dtype(out_dtype)
        x_item = jnp.dtype(x.dtype).itemsize
        o_item = jnp.dtype(dt_out).itemsize

        # Batch lives on the 128-lane axis: pad to a multiple of 128 only (not of the
        # tile); the ragged last grid block handles the remainder.
        Bp = _round_up(B, 128)
        tb = min(_round_up(tile_b, 128), Bp)
        # Give the "parallel" batch axis >=2 steps when the batch allows, so both v7x
        # TensorCores get work.
        if Bp > 128 and _cdiv(Bp, tb) < 2:
            tb = _round_up(_cdiv(Bp, 2), 128)
        # Keep double-buffered in+out (+ concat temp) comfortably inside scoped VMEM.
        per_col = 2 * (C * x_item + out_channels * o_item) + out_channels * 4
        tb = max(128, min(tb, ((24 << 20) // per_col) // 128 * 128))
        grid = (_cdiv(Bp, tb),)

        # (B, C) -> zero-padded, transposed (C, Bp).  The input is (2*N_freqs+1)x
        # smaller than the output, so this transpose is cheap.
        x_t = jnp.pad(x, ((0, Bp - B), (0, 0))).T

        n_direct = _cdiv(N_freqs, da_restart) if logscale else N_freqs
        cost = pl.CostEstimate(
            flops=int(6 * max(N_freqs, 1) * Bp * C),
            transcendentals=int(2 * max(n_direct, 0) * Bp * C),
            bytes_accessed=int(Bp * C * x_item + Bp * out_channels * o_item),
        )
        vmem_need = per_col * tb
        vmem_limit = int(min(max(2 * vmem_need, 32 << 20), 48 << 20))

        out_t = pl.pallas_call(
            kernel,
            out_shape=jax.ShapeDtypeStruct((out_channels, Bp), dt_out),
            grid_spec=pltpu.PrefetchScalarGridSpec(
                num_scalar_prefetch=0,
                grid=grid,
                in_specs=[pl.BlockSpec((C, tb), lambda i: (0, i))],
                out_specs=pl.BlockSpec((out_channels, tb), lambda i: (0, i)),
            ),
            compiler_params=pltpu.CompilerParams(
                dimension_semantics=("parallel",),
                vmem_limit_bytes=vmem_limit),
            cost_estimate=cost,
        )(x_t)

        if transposed_output:
            # Lane-dense (C_out, B) slab; downstream matmuls can consume it directly.
            return out_t[:, :B]
        # TODO(synk): fuse the first NeRF-MLP matmul into this kernel (the (C_out, tb)
        # tile is a ready MXU operand) or consume the transposed slab downstream; the
        # XLA transpose below re-reads and re-writes the whole output slab.
        return out_t.T[:B]

    return embed


def embedding_ref(x, in_channels, N_freqs, logscale=True):
    """Pure-JAX reference mirroring the PyTorch forward."""
    if logscale:
        freq_bands = 2.0 ** jnp.linspace(0.0, N_freqs - 1, N_freqs)
    else:
        freq_bands = jnp.linspace(1.0, 2.0 ** (N_freqs - 1), N_freqs)
    out = [x]
    for freq in freq_bands:
        out.append(jnp.sin(freq * x))
        out.append(jnp.cos(freq * x))
    return jnp.concatenate(out, axis=-1)


if __name__ == "__main__":
    # Case 1: typical NeRF xyz embedding (C=3, N_freqs=10), batch not a multiple of 128.
    # Exercises the >=2-step split and the ragged last block, and validates double-angle
    # accuracy at N_freqs=10.
    C1, N1, B1 = 3, 10, 300
    x1 = jax.random.normal(jax.random.PRNGKey(0), (B1, C1), dtype=jnp.float32)
    out1 = jax.block_until_ready(make_embedding(C1, N1, logscale=True)(x1))
    ref1 = embedding_ref(x1, C1, N1, logscale=True)
    assert out1.shape == (B1, C1 * (2 * N1 + 1)), out1.shape
    assert jnp.allclose(out1, ref1, atol=1e-4, rtol=1e-4), "mismatch (logscale, N=10)"

    # Case 2: direction embedding (C=3, N_freqs=4), tiny batch -> single 128-lane tile.
    C2, N2, B2 = 3, 4, 16
    x2 = jax.random.normal(jax.random.PRNGKey(1), (B2, C2), dtype=jnp.float32)
    out2 = jax.block_until_ready(make_embedding(C2, N2, logscale=True)(x2))
    ref2 = embedding_ref(x2, C2, N2, logscale=True)
    assert out2.shape == (B2, C2 * (2 * N2 + 1)), out2.shape
    assert jnp.allclose(out2, ref2, atol=1e-4, rtol=1e-4), "mismatch (tiny batch)"

    # Case 3: non-logscale frequencies (direct sin/cos path), per-slab store fallback,
    # small explicit tile -> multi-step grid.
    C3, N3, B3 = 3, 4, 1000
    x3 = jax.random.normal(jax.random.PRNGKey(2), (B3, C3), dtype=jnp.float32)
    out3 = jax.block_until_ready(
        make_embedding(C3, N3, logscale=False, tile_b=128, single_store=False)(x3))
    ref3 = embedding_ref(x3, C3, N3, logscale=False)
    assert out3.shape == (B3, C3 * (2 * N3 + 1)), out3.shape
    assert jnp.allclose(out3, ref3, atol=1e-4, rtol=1e-4), "mismatch (non-logscale)"

    print("KERNEL_OK")
</pallas_src>

<mosaic_0001>
module attributes {stable_mosaic.version = 11 : i64} {
  func.func @_embedding_kernel(%arg0: i32, %arg1: memref<3x256xf32, #tpu.memory_space<vmem>>, %arg2: memref<63x256xf32, #tpu.memory_space<vmem>>) attributes {dimension_semantics = [#tpu.dimension_semantics<parallel>], iteration_bounds = array<i64: 2>, scalar_prefetch = 0 : i64, scratch_operands = 0 : i64, tpu.core_type = #tpu.core_type<tc>, window_params = [{transform_indices = @transform_0, window_bounds = array<i64: 3, 256>}, {transform_indices = @transform_1, window_bounds = array<i64: 63, 256>}]} {
    %c0 = arith.constant 0 : index
    %c0_0 = arith.constant 0 : index
    %0 = vector.load %arg1[%c0, %c0_0] : memref<3x256xf32, #tpu.memory_space<vmem>>, vector<3x256xf32>
    %1 = math.sin %0 : vector<3x256xf32>
    %2 = math.cos %0 : vector<3x256xf32>
    %cst = arith.constant 2.000000e+00 : f32
    %3 = vector.broadcast %cst : f32 to vector<3x256xf32>
    %4 = arith.mulf %3, %1 : vector<3x256xf32>
    %5 = arith.mulf %4, %2 : vector<3x256xf32>
    %6 = arith.subf %2, %1 : vector<3x256xf32>
    %7 = arith.addf %2, %1 : vector<3x256xf32>
    %8 = arith.mulf %6, %7 : vector<3x256xf32>
    %cst_1 = arith.constant 2.000000e+00 : f32
    %9 = vector.broadcast %cst_1 : f32 to vector<3x256xf32>
    %10 = arith.mulf %9, %5 : vector<3x256xf32>
    %11 = arith.mulf %10, %8 : vector<3x256xf32>
    %12 = arith.subf %8, %5 : vector<3x256xf32>
    %13 = arith.addf %8, %5 : vector<3x256xf32>
    %14 = arith.mulf %12, %13 : vector<3x256xf32>
    %cst_2 = arith.constant 2.000000e+00 : f32
    %15 = vector.broadcast %cst_2 : f32 to vector<3x256xf32>
    %16 = arith.mulf %15, %11 : vector<3x256xf32>
    %17 = arith.mulf %16, %14 : vector<3x256xf32>
    %18 = arith.subf %14, %11 : vector<3x256xf32>
    %19 = arith.addf %14, %11 : vector<3x256xf32>
    %20 = arith.mulf %18, %19 : vector<3x256xf32>
    %cst_3 = arith.constant 1.600000e+01 : f32
    %21 = vector.broadcast %cst_3 : f32 to vector<3x256xf32>
    %22 = arith.mulf %21, %0 : vector<3x256xf32>
    %23 = math.sin %22 : vector<3x256xf32>
    %24 = math.cos %22 : vector<3x256xf32>
    %cst_4 = arith.constant 2.000000e+00 : f32
    %25 = vector.broadcast %cst_4 : f32 to vector<3x256xf32>
    %26 = arith.mulf %25, %23 : vector<3x256xf32>
    %27 = arith.mulf %26, %24 : vector<3x256xf32>
    %28 = arith.subf %24, %23 : vector<3x256xf32>
    %29 = arith.addf %24, %23 : vector<3x256xf32>
    %30 = arith.mulf %28, %29 : vector<3x256xf32>
    %cst_5 = arith.constant 2.000000e+00 : f32
    %31 = vector.broadcast %cst_5 : f32 to vector<3x256xf32>
    %32 = arith.mulf %31, %27 : vector<3x256xf32>
    %33 = arith.mulf %32, %30 : vector<3x256xf32>
    %34 = arith.subf %30, %27 : vector<3x256xf32>
    %35 = arith.addf %30, %27 : vector<3x256xf32>
    %36 = arith.mulf %34, %35 : vector<3x256xf32>
    %cst_6 = arith.constant 2.000000e+00 : f32
    %37 = vector.broadcast %cst_6 : f32 to vector<3x256xf32>
    %38 = arith.mulf %37, %33 : vector<3x256xf32>
    %39 = arith.mulf %38, %36 : vector<3x256xf32>
    %40 = arith.subf %36, %33 : vector<3x256xf32>
    %41 = arith.addf %36, %33 : vector<3x256xf32>
    %42 = arith.mulf %40, %41 : vector<3x256xf32>
    %cst_7 = arith.constant 2.560000e+02 : f32
    %43 = vector.broadcast %cst_7 : f32 to vector<3x256xf32>
    %44 = arith.mulf %43, %0 : vector<3x256xf32>
    %45 = math.sin %44 : vector<3x256xf32>
    %46 = math.cos %44 : vector<3x256xf32>
    %cst_8 = arith.constant 2.000000e+00 : f32
    %47 = vector.broadcast %cst_8 : f32 to vector<3x256xf32>
    %48 = arith.mulf %47, %45 : vector<3x256xf32>
    %49 = arith.mulf %48, %46 : vector<3x256xf32>
    %50 = arith.subf %46, %45 : vector<3x256xf32>
    %51 = arith.addf %46, %45 : vector<3x256xf32>
    %52 = arith.mulf %50, %51 : vector<3x256xf32>
    %53 = tpu.concatenate %0, %1, %2, %5, %8, %11, %14, %17, %20, %23, %24, %27, %30, %33, %36, %39 in 0 : vector<3x256xf32>, vector<3x256xf32>, vector<3x256xf32>, vector<3x256xf32>, vector<3x256xf32>, vector<3x256xf32>, vector<3x256xf32>, vector<3x256xf32>, vector<3x256xf32>, vector<3x256xf32>, vector<3x256xf32>, vector<3x256xf32>, vector<3x256xf32>, vector<3x256xf32>, vector<3x256xf32>, vector<3x256xf32> -> vector<48x256xf32>
    %54 = tpu.concatenate %42, %45, %46, %49, %52 in 0 : vector<3x256xf32>, vector<3x256xf32>, vector<3x256xf32>, vector<3x256xf32>, vector<3x256xf32> -> vector<15x256xf32>
    %55 = tpu.concatenate %53, %54 in 0 : vector<48x256xf32>, vector<15x256xf32> -> vector<63x256xf32>
    %c0_9 = arith.constant 0 : index
    %c0_10 = arith.constant 0 : index
    %56 = vector.load %arg2[%c0_9, %c0_10] : memref<63x256xf32, #tpu.memory_space<vmem>>, vector<63x256xf32>
    tpu.vector_store %arg2[%c0_9, %c0_10], %55 {strides = array<i32>} : memref<63x256xf32, #tpu.memory_space<vmem>>, vector<63x256xf32>,
    return
  }
  func.func @transform_0(%arg0: i32) -> (i32, i32) {
    %c0_i32 = arith.constant 0 : i32
    %c0_i32_0 = arith.constant 0 : i32
    return %c0_i32, %arg0 : i32, i32
  }
  func.func @transform_1(%arg0: i32) -> (i32, i32) {
    %c0_i32 = arith.constant 0 : i32
    %c0_i32_0 = arith.constant 0 : i32
    return %c0_i32, %arg0 : i32, i32
  }
}

</mosaic_0001>

<bundles_post_ra>
// kernel: tpu_custom_call.1
= control target key start
LH: loop header
LB: loop body
LE: loop exit
PB: predicated region body
PF: predicated region fallthrough
CT: control target
= control target key end

     0   :  { %6 = vsyncpa [#allocation3], 0  ;;  %s1766_s0 = inlined_call_operand.hbm [shape: f32[3,384], index: 0, kind: input, shape index: {}]   ;;  %s1767_s1 = inlined_call_operand.hbm [shape: f32[63,384], index: 1, kind: output, shape index: {}]  }
   0x1   :  { %8 = vsyncpa [#allocation3 + $0x1], 0 }
   0x2   :  { %9 = vsyncpa [#allocation4], 0 }
   0x3   :  { %11 = vsyncpa [#allocation4 + $0x1], 0  ;;  %s1308_s6 = smov 0   ;;  %s1310_s7 = smov 0  }
   0x4   :  { %s1312_s8 = smov 0   ;;  %s1314_s9 = smov 0  }
   0x5 LB: > { %s1329_s10 = sadd.s32 4294967295, %s1286_s9   ;;  %s1069_s11 = sadd.s32 4294967294, %s1286_s9   ;;  %s1286_s9 = sphi %s1314_s9, %s1782_s9   ;;  %s1282_s8 = sphi %s1312_s8, %s1781_s8   ;;  %s1278_s7 = sphi %s1310_s7, %s1780_s7   ;;  %s1274_s6 = sphi %s1308_s6, %s1779_s6  }
   0x6   : > { %s1333_s12 = sadd.s32 1, %s1286_s9   ;;  %s24_s13 = sadd.s32 1, %s1282_s8 }
   0x7   : > { %s21_s14 = ssub.s32 %s1286_s9, %s1333_s12  ;;  %p31_p0 = scmp.ne.s32.totalorder %s1282_s8, %s1278_s7 }
   0x8   : > { %p22_p1 = scmp.eq.s32.totalorder %s21_s14, 0  ;;  %p32_p2 = scmp.eq.s32.totalorder %s1286_s9, 0 }
   0x9   : > { %p37_p3 = scmp.ne.s32.totalorder %s1278_s7, %s1274_s6  ;;  %p38_p4 = scmp.eq.s32.totalorder %s1329_s10, 0 }
   0xa   : > { %s1345_s15 = scalar_select %p22_p1, %s1282_s8, %s24_s13  }
   0xb   : > { %p33_p5 = por %p32_p2, %p31_p0  ;;  %p1347_p6 = por %p38_p4, %p37_p3 }
   0xc   : > { %p61_p7 = scmp.eq.s32.totalorder %s1329_s10, 1  ;;  %p67_p8 = scmp.eq.s32.totalorder %s1069_s11, 1 }
   0xd   : > { %s1770_s16 = scalar_select %p1347_p6, 1, 0 }
   0xe   : > { %p1352_p9 = por %p61_p7, %p31_p0  ;;  %p1356_p10 = por %p67_p8, %p37_p3 }
   0xf   : > { %p1768_p11 = scmp.ge.s32.totalorder %s1286_s9, 2 }
  0x10   : > { %s1771_s17 = scalar_select %p1352_p9, 1, 0 }
  0x11   : > { %s1772_s18 = scalar_select %p1356_p10, 1, 0 }
  0x12   : > { %83 = sbr.rel (%p1768_p11) target bundleno = 59 (0x3b), region = 16 }
  0x19   : > { %86 = sbr.rel (!%p33_p5) target bundleno = 59 (0x3b), region = 20  ;;  %s87_s19 = sand.u32 (%p33_p5), 1, %s1282_s8  }
  0x1a   : > { %s1073_s20 = sshll.u32 (%p33_p5), %s1286_s9, 1  ;;  %s1072_s21 = sshll.u32 (%p33_p5), %s87_s19, 3 }
  0x1b   : > { %s93_s22 = ssub.s32 (%p33_p5), 3, %s1073_s20  ;;  %s1368_s25 = scalar_lea.sflag (%p33_p5), [#allocation3], %s87_s19 }
  0x1c   : > { %p94_p12 = scmp.lt.s32.totalorder (%p33_p5), %s93_s22, 2  ;;  %s91_s26 = scalar_lea.vmem (%p33_p5), [#allocation2], %s1072_s21 }
  0x20   : > { %s1784_s22 = smov (!%p94_p12, %s93_s22), 2 }
  0x21   : > { %s1365_s23 = sshll.u32 %s1784_s22, 6 }
  0x22   : > { %s98_s24 = ssub.s32 128, %s1365_s23 }
  0x23   : > { %99 = vsyncadd %s1368_s25, %s98_s24  ;;  %p1075_p13 = scmp.ne.s32.totalorder %s1365_s23, 0  ;;  %s1116_s27 = sshll.u32 %s1286_s9, 7 }
  0x24   : > { %s1376_s30 = scalar_lea.hbm %s1766_s0, %s1116_s27  ;;  %s105_s2 = sshll.u32 %s91_s26, 4  ;;  %s106_s2 = int_to_ptr.vmem [resolvable:$true] %s105_s2 }
  0x25   : > { %s1192_s3 = scalar_lea.hbm %s1376_s30, %s1365_s23  ;;  %s1196_s11 = scalar_lea.hbm %s1766_s0, 192 }
  0x26   : > { %p1193_p0 = scmp.ne.s32.totalorder %s1376_s30, %s1192_s3  ;;  %p1197_p3 = scmp.lt.u32.totalorder %s1376_s30, %s1766_s0 }
  0x27   : > { %p1198_p4 = scmp.lt.u32.totalorder %s1196_s11, %s1192_s3  ;;  %p1200_p7 = scmp.lt.u32.totalorder %s1192_s3, %s1376_s30 }
  0x28   : > { %p1194_p1 = pnand %p1193_p0, %p1075_p13 }
  0x29   : > { %p1199_p5 = por %p1198_p4, %p1197_p3 }
  0x2a   : > { %p1195_p2 = pneg %p1194_p1 }
  0x2b   : > { %p1201_p8 = por %p1200_p7, %p1199_p5 }
  0x2d   : > { %p1202_p12 = pnand %p1201_p8, %p1195_p2 }
  0x2f   : > { %1205 = shalt.err (!%p1202_p12)
}
  0x30   : > { %s1206_s19 = scalar_lea.vmem %s106_s2, %s1365_s23  ;;  %s1288_s20 = smov [#allocation2]  }
  0x31   : > { %p1207_p11 = scmp.ne.s32.totalorder %s106_s2, %s1206_s19  ;;  %s1210_s21 = sshll.u32 %s1288_s20, 4  ;;  %s1211_s21 = int_to_ptr.vmem [resolvable:$false] %s1210_s21 }
  0x32   : > { %s1212_s22 = scalar_lea.vmem %s1211_s21, 256  ;;  %p1213_p10 = scmp.lt.s32.totalorder %s106_s2, %s1211_s21 }
  0x33   : > { %p1208_p0 = pnand %p1207_p11, %p1075_p13  ;;  %p1214_p9 = scmp.lt.s32.totalorder %s1212_s22, %s1206_s19 }
  0x35   : > { %p1209_p1 = pneg %p1208_p0  ;;  %p1215_p6 = por %p1214_p9, %p1213_p10 }
  0x37   : > { %p1216_p3 = pnand %p1215_p6, %p1209_p1 }
  0x39   : > { %1219 = shalt.err (!%p1216_p3)
}
  0x3a   : > { %108 = dma.hbm_to_vmem [thread:$0]  (%p1075_p13), %s1376_s30, %s1365_s23, %s106_s2, %s1368_s25  }
  0x3b PF: > { %p1079_p11 = scmp.ge.s32.totalorder %s1286_s9, 1  ;;  %p110_p2 = scmp.lt.s32.totalorder %s1286_s9, 3 }
  0x3d   : > { %p111_p4 = pnand %p1079_p11, %p110_p2 }
  0x3e   : > { %s1402_s24 = sand.u32 (!%p111_p4), 1, %s1278_s7   ;;  %p1773_p6 = scmp.ne.s32.totalorder (!%p111_p4), %s1770_s16, 0 }
  0x3f   : > { %114 = sbr.rel (%p111_p4) target bundleno = 247 (0xf7), region = 24  ;;  %s1080_s26 = sshll.u32 (!%p111_p4), %s1402_s24, 3 }
  0x40   : > { %s117_s27 = scalar_lea.sflag (!%p111_p4), [#allocation3], %s1402_s24  ;;  %s120_s28 = scalar_lea.vmem (!%p111_p4), [#allocation2], %s1080_s26 }
  0x46   : > { %1265 = dma.done.wait (%p1773_p6), %s117_s27, 128  }
  0x47   : > { %1267 = vsyncadd (%p1773_p6), %s117_s27, 4294967168  ;;  %v1410_v0 = vld [vmem:[%s120_s28] sm:$0x77]  ;;  %v1289_v26 = vmov 683565275   ;;  %s1081_s16 = sshll.u32 %s1402_s24, 7 }
  0x48   : > { %v150_v1 = vand.u32 2147483647, %v1410_v0  ;;  %v153_v2 = vand.u32 2139095040, %v1410_v0  ;;  %v1415_v3 = vmul.f32 16.0, %v1410_v0  ;;  %v1418_v4 = vmul.f32 256.0, %v1410_v0  ;;  %s1616_s23 = scalar_lea.vmem [#allocation5], %s1081_s16 }
  0x49   : > { %v1290_v28 = vmov 2475754826   ;;  %v1291_v30 = vmov 2131351028   ;;  %v1292_v32 = vmov 2102212464  }
  0x4a   : > { %v154_v5 = vshrl.u32 %v153_v2, 23  ;;  %v157_v6 = vand.u32 8388607, %v150_v1  ;;  %v373_v7 = vand.u32 2147483647, %v1415_v3  ;;  %v376_v8 = vand.u32 2139095040, %v1415_v3 }
  0x4b   : > { %v599_v12 = vand.u32 2139095040, %v1418_v4  ;;  %v1293_v34 = vmov 920167782   ;;  %v1294_v41 = vmov 1326507024   ;;  %s976_s25 = scalar_lea.sflag [#allocation4], %s1402_s24 }
  0x4c   : > { %v1082_v9 = vadd.s32 4294967169, %v154_v5  ;;  %v377_v10 = vshrl.u32 %v376_v8, 23  ;;  %v380_v11 = vand.u32 8388607, %v373_v7  ;;  %v158_v14 = vor.u32 8388608, %v157_v6  ;;  %p1776_p9 = scmp.ne.s32.totalorder %s1771_s17, 0 }
  0x4d   : > { %v600_v17 = vshrl.u32 %v599_v12, 23  ;;  %s1107_s29 = sshll.u32 (%p1776_p9), %s1329_s10, 1 }
  0x4e   : > { %v160_v13 = vadd.s32 1, %v1082_v9  ;;  %v1090_v15 = vadd.s32 4294967169, %v377_v10  ;;  %v381_v16 = vor.u32 8388608, %v380_v11  ;;  %v1427_v22 = vshll.u32 %v158_v14, 8  ;;  %s984_s30 = ssub.s32 (%p1776_p9), 3, %s1107_s29 }
  0x4f   : > { %v1431_v24 = vadd.s32 4294967169, %v600_v17  ;;  %p985_p10 = scmp.lt.s32.totalorder (%p1776_p9), %s984_s30, 2 }
  0x50   : > { %vm161_vm0 = vcmp.gt.s32.totalorder %v160_v13, 0  ;;  %v383_v19 = vadd.s32 1, %v1090_v15  ;;  %v1429_v23 = vshll.u32 %v381_v16, 8 }
  0x51   : > { %v162_v18 = vsel %vm161_vm0, %v160_v13, 0 }
  0x52   : > { %v163_v20 = vshrl.u32 %v162_v18, 5  ;;  %v164_v21 = vand.u32 31, %v162_v18  ;;  %vm384_vm1 = vcmp.gt.s32.totalorder %v383_v19, 0 }
  0x53   : > { %v385_v46 = vsel %vm384_vm1, %v383_v19, 0 }
  0x54   : > { %v165_v25 = vsub.s32 32, %v164_v21  ;;  %v167_v27 = vshll.u32 %v1289_v26, %v164_v21  ;;  %v170_v29 = vshll.u32 %v1290_v28, %v164_v21  ;;  %v173_v31 = vshll.u32 %v1291_v30, %v164_v21 }
  0x55   : > { %v176_v33 = vshll.u32 %v1292_v32, %v164_v21  ;;  %v179_v35 = vshll.u32 %v1293_v34, %v164_v21  ;;  %vm182_vm2 = vcmp.lt.s32.totalorder %v163_v20, 1  ;;  %vm183_vm3 = vcmp.lt.s32.totalorder %v163_v20, 2 }
  0x56   : > { %v166_v36 = vshrl.u32 %v1289_v26, %v165_v25  ;;  %v168_v37 = vshrl.u32 %v1290_v28, %v165_v25  ;;  %v171_v38 = vshrl.u32 %v1291_v30, %v165_v25  ;;  %v174_v39 = vshrl.u32 %v1292_v32, %v165_v25 }
  0x57   : > { %v177_v40 = vshrl.u32 %v1293_v34, %v165_v25  ;;  %v180_v42 = vshrl.u32 %v1294_v41, %v165_v25  ;;  %vm184_vm4 = vcmp.lt.s32.totalorder %v163_v20, 3  ;;  %vm185_vm5 = vcmp.lt.s32.totalorder %v163_v20, 4 }
  0x58   : > { %v169_v43 = vor.u32 %v168_v37, %v167_v27  ;;  %v172_v44 = vor.u32 %v171_v38, %v170_v29  ;;  %v175_v45 = vor.u32 %v174_v39, %v173_v31  ;;  %v386_v49 = vshrl.u32 %v385_v46, 5 }
  0x59   : > { %v178_v47 = vor.u32 %v177_v40, %v176_v33  ;;  %v181_v48 = vor.u32 %v180_v42, %v179_v35  ;;  %v387_v50 = vand.u32 31, %v385_v46  ;;  %v606_v29 = vadd.s32 1, %v1431_v24 }
  0x5a   : > { %v186_v51 = vsel %vm182_vm2, %v166_v36, %v169_v43  ;;  %v187_v52 = vsel %vm185_vm5, %v175_v45, 2102212464  ;;  %v190_v53 = vsel %vm182_vm2, %v169_v43, %v172_v44  ;;  %v194_v54 = vsel %vm182_vm2, %v172_v44, %v175_v45 }
  0x5b   : > { %v188_v55 = vsel %vm184_vm4, %v172_v44, %v187_v52  ;;  %v191_v56 = vsel %vm185_vm5, %v178_v47, 920167782  ;;  %v195_v57 = vsel %vm185_vm5, %v181_v48, 1326507024  ;;  %v388_v58 = vsub.s32 32, %v387_v50 }
  0x5c   : > { %v189_v59 = vsel %vm183_vm3, %v186_v51, %v188_v55  ;;  %v192_v60 = vsel %vm184_vm4, %v175_v45, %v191_v56  ;;  %v196_v61 = vsel %vm184_vm4, %v178_v47, %v195_v57  ;;  %v390_v62 = vshll.u32 %v1289_v26, %v387_v50 }
  0x5d   : > { %v193_v63 = vsel %vm183_vm3, %v190_v53, %v192_v60  ;;  %v197_v2 = vsel %vm183_vm3, %v194_v54, %v196_v61  ;;  %v205_v5 = vmul.u32 %v1427_v22, %v189_v59  ;;  %v389_v6 = vshrl.u32 %v1289_v26, %v388_v58 }
  0x5e   : > { %v1458_v8 = vmul.u32.u64.low %v1427_v22, %v197_v2  ;;  %v1459_v9 = vmul.u32.u64.high %v1427_v22, %v197_v2, %v1458_v8  ;;  %v1462_v10 = vmul.u32.u64.low %v1427_v22, %v193_v63  ;;  %v1463_v11 = vmul.u32.u64.high %v1427_v22, %v193_v63, %v1462_v10 }
  0x5f   : > { %v391_v12 = vshrl.u32 %v1290_v28, %v388_v58  ;;  %v393_v13 = vshll.u32 %v1290_v28, %v387_v50  ;;  %v394_v14 = vshrl.u32 %v1291_v30, %v388_v58  ;;  %v396_v15 = vshll.u32 %v1291_v30, %v387_v50 }
  0x60   : > { %v397_v16 = vshrl.u32 %v1292_v32, %v388_v58  ;;  %v399_v17 = vshll.u32 %v1292_v32, %v387_v50  ;;  %v400_v18 = vshrl.u32 %v1293_v34, %v388_v58  ;;  %v402_v19 = vshll.u32 %v1293_v34, %v387_v50 }
  0x61   : > { %v392_v20 = vor.u32 %v391_v12, %v390_v62  ;;  %v395_v21 = vor.u32 %v394_v14, %v393_v13  ;;  %v403_v22 = vshrl.u32 %v1294_v41, %v388_v58  ;;  %vm405_vm6 = vcmp.lt.s32.totalorder %v386_v49, 1 }
  0x62   : > { %vm207_vm7 = vc.u32 %v1459_v9, %v1462_v10  ;;  %v208_v25 = vadd.s32 1, %v1463_v11  ;;  %v398_v27 = vor.u32 %v397_v16, %v396_v15  ;;  %v401_v31 = vor.u32 %v400_v18, %v399_v17 }
  0x63   : > { %v404_v33 = vor.u32 %v403_v22, %v402_v19  ;;  %vm406_vm8 = vcmp.lt.s32.totalorder %v386_v49, 2  ;;  %vm407_vm9 = vcmp.lt.s32.totalorder %v386_v49, 3  ;;  %vm408_vm10 = vcmp.lt.s32.totalorder %v386_v49, 4 }
  0x64   : > { %v209_v35 = vsel %vm207_vm7, %v208_v25, %v1463_v11  ;;  %v409_v36 = vsel %vm405_vm6, %v389_v6, %v392_v20  ;;  %v413_v37 = vsel %vm405_vm6, %v392_v20, %v395_v21  ;;  %v410_v39 = vsel %vm408_vm10, %v398_v27, 2102212464 }
  0x65   : > { %v210_v38 = vadd.s32 %v209_v35, %v205_v5  ;;  %v414_v40 = vsel %vm408_vm10, %v401_v31, 920167782  ;;  %v417_v42 = vsel %vm405_vm6, %v395_v21, %v398_v27  ;;  %v411_v43 = vsel %vm407_vm9, %v395_v21, %v410_v39 }
  0x66   : > { %v415_v44 = vsel %vm407_vm9, %v398_v27, %v414_v40  ;;  %v418_v45 = vsel %vm408_vm10, %v404_v33, 1326507024  ;;  %vm607_vm11 = vcmp.gt.s32.totalorder %v606_v29, 0  ;;  %v412_v48 = vsel %vm406_vm8, %v409_v36, %v411_v43 }
  0x67   : > { %v211_v24 = vadd.s32 536870912, %v210_v38  ;;  %v416_v46 = vsel %vm406_vm8, %v413_v37, %v415_v44  ;;  %v419_v47 = vsel %vm407_vm9, %v401_v31, %v418_v45  ;;  %v608_v56 = vsel %vm607_vm11, %v606_v29, 0 }
  0x68   : > { %v420_v50 = vsel %vm406_vm8, %v417_v42, %v419_v47  ;;  %v1487_v51 = vmul.u32.u64.low %v1429_v23, %v416_v46  ;;  %v1488_v52 = vmul.u32.u64.high %v1429_v23, %v416_v46, %v1487_v51  ;;  %v610_v57 = vand.u32 31, %v608_v56 }
  0x69   : > { %v1491_v53 = vshrl.u32 %v211_v24, 30  ;;  %v1494_v54 = vmul.u32.u64.low %v1429_v23, %v420_v50  ;;  %v1495_v55 = vmul.u32.u64.high %v1429_v23, %v420_v50, %v1494_v54  ;;  %v428_v59 = vmul.u32 %v1429_v23, %v412_v48 }
  0x6a   : > { %v431_v49 = vadd.s32 1, %v1488_v52  ;;  %v596_v61 = vand.u32 2147483647, %v1418_v4  ;;  %v611_v63 = vsub.s32 32, %v610_v57  ;;  %v613_v23 = vshll.u32 %v1289_v26, %v610_v57 }
  0x6b   : > { %v213_v58 = vshll.u32 %v1491_v53, 30  ;;  %vm430_vm12 = vc.u32 %v1495_v55, %v1487_v51  ;;  %v616_v13 = vshll.u32 %v1290_v28, %v610_v57  ;;  %v619_v16 = vshll.u32 %v1291_v30, %v610_v57 }
  0x6c   : > { %v432_v62 = vsel %vm430_vm12, %v431_v49, %v1488_v52  ;;  %v603_v8 = vand.u32 8388607, %v596_v61  ;;  %v614_v12 = vshrl.u32 %v1290_v28, %v611_v63  ;;  %v617_v15 = vshrl.u32 %v1291_v30, %v611_v63 }
  0x6d   : > { %v214_v60 = vsub.s32 %v210_v38, %v213_v58  ;;  %v433_v5 = vadd.s32 %v432_v62, %v428_v59  ;;  %v620_v17 = vshrl.u32 %v1292_v32, %v611_v63  ;;  %v622_v20 = vshll.u32 %v1292_v32, %v610_v57 }
  0x6e   : > { %v623_v21 = vshrl.u32 %v1293_v34, %v611_v63  ;;  %v206_v22 = vadd.s32 %v1462_v10, %v1459_v9  ;;  %v604_v28 = vor.u32 8388608, %v603_v8  ;;  %v609_v27 = vshrl.u32 %v608_v56, 5 }
  0x6f   : > { %v216_v2 = vsub.s32 0, %v214_v60  ;;  %v434_v11 = vadd.s32 536870912, %v433_v5  ;;  %v615_v29 = vor.u32 %v614_v12, %v613_v23  ;;  %v618_v31 = vor.u32 %v617_v15, %v616_v13 }
  0x70   : > { %v621_v30 = vor.u32 %v620_v17, %v619_v16  ;;  %v625_v36 = vshll.u32 %v1293_v34, %v610_v57  ;;  %v626_v32 = vshrl.u32 %v1294_v41, %v611_v63  ;;  %v624_v40 = vor.u32 %v623_v21, %v622_v20 }
  0x71   : > { %v1083_v6 = vmin.u32 %v216_v2, %v214_v60  ;;  %v1512_v18 = vshrl.u32 %v434_v11, 30  ;;  %v612_v10 = vshrl.u32 %v1289_v26, %v611_v63  ;;  %vm628_vm14 = vcmp.lt.s32.totalorder %v609_v27, 1 }
  0x72   : > { %vm631_vm15 = vcmp.lt.s32.totalorder %v609_v27, 4  ;;  %v644_v45 = vshll.u32 %v604_v28, 8  ;;  %v627_v34 = vor.u32 %v626_v32, %v625_v36  ;;  %vm629_vm0 = vcmp.lt.s32.totalorder %v609_v27, 2 }
  0x73   : > { %v218_v14 = vclz %v1083_v6  ;;  %v436_v25 = vshll.u32 %v1512_v18, 30  ;;  %v633_v44 = vsel %vm631_vm15, %v621_v30, 2102212464  ;;  %vm630_vm1 = vcmp.lt.s32.totalorder %v609_v27, 3 }
  0x74   : > { %v636_v47 = vsel %vm628_vm14, %v615_v29, %v618_v31  ;;  %v637_v48 = vsel %vm631_vm15, %v624_v40, 920167782  ;;  %vm152_vm2 = vcmp.lt.s32.totalorder %v1410_v0, 0  ;;  %v632_v50 = vsel %vm628_vm14, %v612_v10, %v615_v29 }
  0x75   : > { %v1084_v19 = vadd.s32 4294967294, %v218_v14  ;;  %v1519_v35 = vsub.s32 %v433_v5, %v436_v25  ;;  %v634_v52 = vsel %vm630_vm1, %v618_v31, %v633_v44  ;;  %v638_v57 = vsel %vm630_vm1, %v621_v30, %v637_v48 }
  0x76   : > { %v640_v58 = vsel %vm628_vm14, %v618_v31, %v621_v30  ;;  %v236_v59 = vsub.s32 4, %v1491_v53  ;;  %v641_v62 = vsel %vm631_vm15, %v627_v34, 1326507024  ;;  %v429_v8 = vadd.s32 %v1487_v51, %v1495_v55 }
  0x77   : > { %vm1085_vm13 = vcmp.lt.s32.totalorder %v1084_v19, 0  ;;  %v439_v9 = vsub.s32 0, %v1519_v35  ;;  %v642_v2 = vsel %vm630_vm1, %v624_v40, %v641_v62  ;;  %v635_v11 = vsel %vm629_vm0, %v632_v50, %v634_v52 }
  0x78   : > { %v221_v33 = vsel %vm1085_vm13, 0, %v1084_v19  ;;  %v643_v23 = vsel %vm629_vm0, %v640_v58, %v642_v2  ;;  %v237_v16 = vsel %vm152_vm2, %v236_v59, %v1491_v53  ;;  %vm151_vm4 = vcmp.le.f32.partialorder %v150_v1, 0.7853982 }
  0x79   : > { %v222_v37 = vsub.s32 32, %v221_v33  ;;  %v223_v38 = vshll.u32 %v214_v60, %v221_v33  ;;  %v226_v39 = vsub.s32 4294967266, %v221_v33  ;;  %v1091_v24 = vmin.u32 %v439_v9, %v1519_v35 }
  0x7a   : > { %v639_v60 = vsel %vm629_vm0, %v636_v47, %v638_v57  ;;  %v1546_v14 = vmul.u32.u64.low %v644_v45, %v643_v23  ;;  %v1547_v15 = vmul.u32.u64.high %v644_v45, %v643_v23, %v1546_v14  ;;  %v651_v55 = vmul.u32 %v644_v45, %v635_v11 }
  0x7b   : > { %v224_v42 = vshrl.u32 %v206_v22, %v222_v37  ;;  %v227_v43 = vadd.s32 127, %v226_v39  ;;  %v441_v26 = vclz %v1091_v24  ;;  %v459_v28 = vsub.s32 4, %v1512_v18 }
  0x7c   : > { %v1538_v5 = vmul.u32.u64.low %v644_v45, %v639_v60  ;;  %v1539_v6 = vmul.u32.u64.high %v644_v45, %v639_v60, %v1538_v5  ;;  %v239_v29 = vsel %vm151_vm4, 0, %v237_v16  ;;  %vm375_vm6 = vcmp.lt.s32.totalorder %v1415_v3, 0 }
  0x7d   : > { %v225_v41 = vor.u32 %v224_v42, %v223_v38  ;;  %v228_v46 = vshll.u32 %v227_v43, 23  ;;  %v1092_v49 = vadd.s32 4294967294, %v441_v26  ;;  %v460_v32 = vsel %vm375_vm6, %v459_v28, %v1512_v18 }
  0x7e   : > { %v654_v21 = vadd.s32 1, %v1539_v6  ;;  %vm653_vm5 = vc.u32 %v1547_v15, %v1538_v5  ;;  %v243_v37 = vadd.s32 3, %v239_v29  ;;  %vm1569_vm7 = vcmp.le.f32.partialorder %v373_v7, 0.7853982 }
  0x7f   : > { %v229_v54 = vor.u32 4788187, %v228_v46  ;;  %v232_v56 = vcvt.s32.f32 %v225_v41  ;;  %vm1093_vm3 = vcmp.lt.s32.totalorder %v1092_v49, 0  ;;  %v462_v9 = vsel %vm1569_vm7, 0, %v460_v32 }
  0x80   : > { %v444_v13 = vsel %vm1093_vm3, 0, %v1092_v49  ;;  %v655_v1 = vsel %vm653_vm5, %v654_v21, %v1539_v6  ;;  %v347_v42 = vand.u32 3, %v239_v29  ;;  %v244_v44 = vand.u32 3, %v243_v37 }
  0x81   : > { %v230_v63 = vand.u32 2147483647, %v229_v54  ;;  %v445_v17 = vsub.s32 32, %v444_v13  ;;  %v446_v19 = vshll.u32 %v1519_v35, %v444_v13  ;;  %v449_v20 = vsub.s32 4294967266, %v444_v13 }
  0x82   : > { %v656_v33 = vadd.s32 %v655_v1, %v651_v55  ;;  %v466_v24 = vadd.s32 3, %v462_v9  ;;  %vm892_vm8 = vcmask 1042432   ;;  %vm348_vm9 = vcmp.lt.s32.totalorder %v347_v42, 2 }
  0x83   : > { %v233_v12 = vmul.f32 %v232_v56, %v230_v63  ;;  %v447_v22 = vshrl.u32 %v429_v8, %v445_v17  ;;  %v450_v25 = vadd.s32 127, %v449_v20  ;;  %vm349_vm10 = vcmp.eq.s32.totalorder %v347_v42, 0 }
  0x84   : > { %v657_v38 = vadd.s32 536870912, %v656_v33  ;;  %vm895_vm11 = vcmask 1045504   ;;  %vm249_vm12 = vcmp.eq.s32.totalorder %v244_v44, 2  ;;  %vm352_vm13 = vcmp.eq.s32.totalorder %v347_v42, 2 }
  0x85   : > { %v234_v51 = vxor.u32 2147483648, %v233_v12  ;;  %v448_v31 = vor.u32 %v447_v22, %v446_v19  ;;  %v451_v30 = vshll.u32 %v450_v25, 23  ;;  %vm246_vm14 = vcmp.eq.s32.totalorder %v244_v44, 0 }
  0x86   : > { %v1575_v10 = vshrl.u32 %v657_v38, 30  ;;  %v1586_v50 = vand.u32 3, %v466_v24  ;;  %vm245_vm15 = vcmp.lt.s32.totalorder %v244_v44, 2  ;;  %vm898_vm0 = vcmask 1040384  }
  0x87   : > { %v235_v27 = vsel %vm152_vm2, %v234_v51, %v233_v12  ;;  %v452_v35 = vor.u32 4788187, %v451_v30  ;;  %v455_v36 = vcvt.s32.f32 %v448_v31  ;;  %vm242_vm1 = vweird.f32 %v1410_v0 }
  0x88   : > { %v238_v53 = vsel %vm151_vm4, %v1410_v0, %v235_v27  ;;  %v659_v45 = vshll.u32 %v1575_v10, 30  ;;  %v1590_v58 = vand.u32 3, %v462_v9  ;;  %vm901_vm2 = vcmask 1043456  }
  0x89   : > { %1180 = vcosq.f32 %v238_v53  ;;  %v453_v40 = vand.u32 2147483647, %v452_v35  ;;  %v809_v2 = vcombine.high %v1410_v0, %v1410_v0  ;;  %vm472_vm3 = vcmp.eq.s32.totalorder %v1586_v50, 2 }
  0x8a   : > { %1182 = vsinq.f32 %v238_v53  ;;  %v1578_v34 = vsub.s32 %v656_v33, %v659_v45  ;;  %vm904_vm4 = vcmask 1046528   ;;  %v1600_v11 = vadd.s32 %v1538_v5, %v1547_v15 }
  0x8b   : > { %v456_v43 = vmul.f32 %v455_v36, %v453_v40  ;;  %vm907_vm5 = vcmask 1041408  }
  0x8c   : > { %v662_v47 = vsub.s32 0, %v1578_v34 }
  0x8d   : > { %v457_v18 = vxor.u32 2147483648, %v456_v43 }
  0x8e   : > { %v1099_v54 = vmin.u32 %v662_v47, %v1578_v34 }
  0x8f   : > { %v458_v7 = vsel %vm375_vm6, %v457_v18, %v456_v43  ;;  %vm469_vm6 = vcmp.eq.s32.totalorder %v1586_v50, 0 }
  0x90   : > { %v461_v46 = vsel %vm1569_vm7, %v1415_v3, %v458_v7  ;;  %v664_v60 = vclz %v1099_v54  ;;  %vm572_vm7 = vcmp.eq.s32.totalorder %v1590_v58, 0 }
  0x91   : > { %1184 = vcosq.f32 %v461_v46 }
  0x92   : > { %1186 = vsinq.f32 %v461_v46  ;;  %v1100_v23 = vadd.s32 4294967294, %v664_v60 }
  0x93   : > { %v1181_v41 = vpop.eup %1180 }
  0x94   : > { %v1183_v48 = vpop.eup %1182  ;;  %v250_v26 = vxor.u32 2147483648, %v1181_v41 }
  0x95   : > { %v247_v52 = vxor.u32 2147483648, %v1183_v48 }
  0x96   : > { %v251_v56 = vsel %vm249_vm12, %v250_v26, %v1183_v48  ;;  %v354_v57 = vsel %vm352_vm13, %v250_v26, %v1183_v48  ;;  %vm575_vm12 = vcmp.eq.s32.totalorder %v1590_v58, 2  ;;  %vm910_vm13 = vcmask 1044480  }
  0x97   : > { %v248_v59 = vsel %vm246_vm14, %v1181_v41, %v247_v52  ;;  %v351_v49 = vsel %vm349_vm10, %v1181_v41, %v247_v52  ;;  %vm468_vm10 = vcmp.lt.s32.totalorder %v1586_v50, 2  ;;  %vm465_vm14 = vweird.f32 %v1415_v3 }
  0x98   : > { %v252_v62 = vsel %vm245_vm15, %v248_v59, %v251_v56  ;;  %v355_v63 = vsel %vm348_vm9, %v351_v49, %v354_v57  ;;  %vm1101_vm9 = vcmp.lt.s32.totalorder %v1100_v23, 0  ;;  %vm571_vm15 = vcmp.lt.s32.totalorder %v1590_v58, 2 }
  0x99   : > { %v253_v6 = vsel %vm242_vm1, nan, %v252_v62  ;;  %v356_v8 = vsel %vm242_vm1, nan, %v355_v63  ;;  %v1608_v15 = vsel %vm1101_vm9, 0, %v1100_v23  ;;  %vm598_vm1 = vcmp.lt.s32.totalorder %v1418_v4, 0 }
  0x9a   : > { %v357_v12 = vmul.f32 2.0, %v253_v6  ;;  %v359_v13 = vsub.f32 %v356_v8, %v253_v6  ;;  %v360_v14 = vadd.f32 %v356_v8, %v253_v6  ;;  %v813_v16 = vrot.slane %v253_v6, 5 }
  0x9b   : > { %v819_v17 = vrot.slane %v356_v8, 2  ;;  %v812_v19 = vcombine.high %v253_v6, %v253_v6  ;;  %v818_v20 = vcombine.high %v356_v8, %v356_v8  ;;  %v668_v28 = vsub.s32 32, %v1608_v15  ;;  %v1185_v27 = vpop.eup %1184 }
  0x9c   : > { %v358_v51 = vmul.f32 %v357_v12, %v356_v8  ;;  %v361_v55 = vmul.f32 %v360_v14, %v359_v13  ;;  %v893_v5 = vsel %vm892_vm8, %v1410_v0, %v813_v16  ;;  %v1187_v30 = vpop.eup %1186  ;;  %v473_v36 = vxor.u32 2147483648, %v1185_v27 }
  0x9d   : > { %v896_v21 = vsel %vm895_vm11, %v893_v5, %v819_v17  ;;  %v814_v22 = vrot.slane %v812_v19, 5  ;;  %v820_v25 = vrot.slane %v818_v20, 2  ;;  %v470_v42 = vxor.u32 2147483648, %v1187_v30 }
  0x9e   : > { %959 = vst [vmem:[%s1616_s23] sm:$0xff] %v896_v21  ;;  %v362_v0 = vmul.f32 2.0, %v358_v51  ;;  %v825_v29 = vrot.slane %v358_v51, 7  ;;  %v830_v53 = vcombine.low %v361_v55, %v361_v55  ;;  %v824_v31 = vcombine.high %v358_v51, %v358_v51 }
  0x9f   : > { %v894_v1 = vsel %vm892_vm8, %v809_v2, %v814_v22  ;;  %v364_v33 = vsub.f32 %v361_v55, %v358_v51  ;;  %v365_v35 = vadd.f32 %v361_v55, %v358_v51  ;;  %v474_v43 = vsel %vm472_vm3, %v473_v36, %v1187_v30 }
  0xa0   : > { %v897_v32 = vsel %vm895_vm11, %v894_v1, %v820_v25  ;;  %v363_v37 = vmul.f32 %v362_v0, %v361_v55  ;;  %v899_v38 = vsel %vm898_vm0, %v819_v17, %v825_v29  ;;  %v826_v39 = vrot.slane %v824_v31, 7 }
  0xa1   : > { %960 = vst [vmem:[%s1616_s23 + $0x8] sm:$0xff] %v897_v32  ;;  %v902_v40 = vsel %vm901_vm2, %v899_v38, %v830_v53  ;;  %v366_v9 = vmul.f32 %v365_v35, %v364_v33  ;;  %v471_v59 = vsel %vm469_vm6, %v1185_v27, %v470_v42  ;;  %v574_v49 = vsel %vm572_vm7, %v1185_v27, %v470_v42 }
  0xa2   : > { %v834_v44 = vrot.slane %v363_v37, 1  ;;  %v833_v45 = vcombine.high %v363_v37, %v363_v37  ;;  %v900_v18 = vsel %vm898_vm0, %v820_v25, %v826_v39  ;;  %v367_v24 = vmul.f32 2.0, %v363_v37 }
  0xa3   : > { %v903_v7 = vsel %vm901_vm2, %v900_v18, %v361_v55  ;;  %v840_v41 = vrot.slane %v366_v9, 6  ;;  %v839_v46 = vcombine.high %v366_v9, %v366_v9  ;;  %v369_v47 = vsub.f32 %v366_v9, %v363_v37 }
  0xa4   : > { %v905_v48 = vsel %vm904_vm4, %v902_v40, %v834_v44  ;;  %v835_v26 = vrot.slane %v833_v45, 1  ;;  %v368_v52 = vmul.f32 %v367_v24, %v366_v9  ;;  %v370_v54 = vadd.f32 %v366_v9, %v363_v37 }
  0xa5   : > { %961 = vst [vmem:[%s1616_s23 + $0x10] sm:$0xff] %v905_v48  ;;  %v908_v56 = vsel %vm907_vm5, %v834_v44, %v840_v41  ;;  %v841_v57 = vrot.slane %v839_v46, 6  ;;  %v475_v8 = vsel %vm468_vm10, %v471_v59, %v474_v43  ;;  %v577_v23 = vsel %vm575_vm12, %v473_v36, %v1187_v30 }
  0xa6   : > { %v906_v60 = vsel %vm904_vm4, %v903_v7, %v835_v26  ;;  %v846_v62 = vrot.slane %v368_v52, 3  ;;  %v845_v63 = vcombine.high %v368_v52, %v368_v52  ;;  %v371_v2 = vmul.f32 %v370_v54, %v369_v47 }
  0xa7   : > { %962 = vst [vmem:[%s1616_s23 + $0x18] sm:$0xff] %v906_v60  ;;  %v909_v6 = vsel %vm907_vm5, %v835_v26, %v841_v57  ;;  %v669_v12 = vshll.u32 %v1578_v34, %v1608_v15  ;;  %v476_v16 = vsel %vm465_vm14, nan, %v475_v8  ;;  %v578_v17 = vsel %vm571_vm15, %v574_v49, %v577_v23 }
  0xa8   : > { %v911_v13 = vsel %vm910_vm13, %v908_v56, %v846_v62  ;;  %v847_v14 = vrot.slane %v845_v63, 3  ;;  %v579_v50 = vsel %vm465_vm14, nan, %v578_v17  ;;  %v580_v19 = vmul.f32 2.0, %v476_v16 }
  0xa9   : > { %963 = vst [vmem:[%s1616_s23 + $0x20] sm:$0xff] %v911_v13  ;;  %v855_v20 = vrot.slane %v476_v16, 5  ;;  %v851_v51 = vcombine.high %v371_v2, %v371_v2  ;;  %v582_v34 = vsub.f32 %v579_v50, %v476_v16  ;;  %v583_v5 = vadd.f32 %v579_v50, %v476_v16 }
  0xaa   : > { %v912_v55 = vsel %vm910_vm13, %v909_v6, %v847_v14  ;;  %v861_v21 = vrot.slane %v579_v50, 2  ;;  %v581_v22 = vmul.f32 %v580_v19, %v579_v50  ;;  %v854_v27 = vcombine.high %v476_v16, %v476_v16 }
  0xab   : > { %964 = vst [vmem:[%s1616_s23 + $0x28] sm:$0xff] %v912_v55  ;;  %v913_v25 = vsel %vm892_vm8, %v371_v2, %v855_v20  ;;  %v860_v58 = vcombine.high %v579_v50, %v579_v50  ;;  %v584_v0 = vmul.f32 %v583_v5, %v582_v34  ;;  %v670_v3 = vshrl.u32 %v1600_v11, %v668_v28 }
  0xac   : > { %v915_v29 = vsel %vm895_vm11, %v913_v25, %v861_v21  ;;  %v672_v53 = vsub.s32 4294967266, %v1608_v15  ;;  %v856_v31 = vrot.slane %v854_v27, 5  ;;  %v585_v1 = vmul.f32 2.0, %v581_v22 }
  0xad   : > { %965 = vst [vmem:[%s1616_s23 + $0x30] sm:$0xff] %v915_v29  ;;  %v862_v30 = vrot.slane %v860_v58, 2  ;;  %v867_v33 = vrot.slane %v581_v22, 7  ;;  %v872_v35 = vcombine.low %v584_v0, %v584_v0  ;;  %v866_v36 = vcombine.high %v581_v22, %v581_v22 }
  0xae   : > { %v587_v32 = vsub.f32 %v584_v0, %v581_v22  ;;  %v588_v37 = vadd.f32 %v584_v0, %v581_v22  ;;  %v914_v38 = vsel %vm892_vm8, %v851_v51, %v856_v31  ;;  %v586_v39 = vmul.f32 %v585_v1, %v584_v0 }
  0xaf   : > { %v917_v40 = vsel %vm898_vm0, %v861_v21, %v867_v33  ;;  %v916_v9 = vsel %vm895_vm11, %v914_v38, %v862_v30  ;;  %v868_v15 = vrot.slane %v866_v36, 7  ;;  %v673_v45 = vadd.s32 127, %v672_v53 }
  0xb0   : > { %v919_v11 = vsel %vm901_vm2, %v917_v40, %v872_v35  ;;  %v589_v28 = vmul.f32 %v588_v37, %v587_v32  ;;  %966 = vst [vmem:[%s1616_s23 + $0x38] sm:$0xff] %v916_v9  ;;  %v876_v42 = vrot.slane %v586_v39, 1  ;;  %v875_v43 = vcombine.high %v586_v39, %v586_v39 }
  0xb1   : > { %v590_v44 = vmul.f32 2.0, %v586_v39  ;;  %v918_v18 = vsel %vm898_vm0, %v862_v30, %v868_v15  ;;  %v671_v41 = vor.u32 %v670_v3, %v669_v12  ;;  %v674_v56 = vshll.u32 %v673_v45, 23 }
  0xb2   : > { %v882_v24 = vrot.slane %v589_v28, 6  ;;  %v881_v7 = vcombine.high %v589_v28, %v589_v28  ;;  %v921_v46 = vsel %vm904_vm4, %v919_v11, %v876_v42  ;;  %v877_v47 = vrot.slane %v875_v43, 1 }
  0xb3   : > { %v920_v48 = vsel %vm901_vm2, %v918_v18, %v584_v0  ;;  %v591_v26 = vmul.f32 %v590_v44, %v589_v28  ;;  %967 = vst [vmem:[%s1616_s23 + $0x40] sm:$0xff] %v921_v46  ;;  %v675_v62 = vor.u32 4788187, %v674_v56  ;;  %v678_v63 = vcvt.s32.f32 %v671_v41 }
  0xb4   : > { %v923_v52 = vsel %vm907_vm5, %v876_v42, %v882_v24  ;;  %v883_v54 = vrot.slane %v881_v7, 6  ;;  %v922_v57 = vsel %vm904_vm4, %v920_v48, %v877_v47  ;;  %v682_v23 = vsub.s32 4, %v1575_v10 }
  0xb5   : > { %v888_v59 = vrot.slane %v591_v26, 3  ;;  %v887_v49 = vcombine.high %v591_v26, %v591_v26  ;;  %968 = vst [vmem:[%s1616_s23 + $0x48] sm:$0xff] %v922_v57  ;;  %v676_v8 = vand.u32 2147483647, %v675_v62  ;;  %vm597_vm3 = vcmp.le.f32.partialorder %v596_v61, 0.7853982 }
  0xb6   : > { %v924_v60 = vsel %vm907_vm5, %v877_v47, %v883_v54  ;;  %v683_v16 = vsel %vm598_vm1, %v682_v23, %v1575_v10  ;;  %v592_v34 = vsub.f32 %v589_v28, %v586_v39  ;;  %v593_v5 = vadd.f32 %v589_v28, %v586_v39 }
  0xb7   : > { %v925_v2 = vsel %vm910_vm13, %v923_v52, %v888_v59  ;;  %v889_v6 = vrot.slane %v887_v49, 3  ;;  %v679_v13 = vmul.f32 %v678_v63, %v676_v8  ;;  %v685_v19 = vsel %vm597_vm3, 0, %v683_v16 }
  0xb8   : > { %969 = vst [vmem:[%s1616_s23 + $0x50] sm:$0xff] %v925_v2  ;;  %v689_v20 = vadd.s32 3, %v685_v19  ;;  %v793_v55 = vand.u32 3, %v685_v19  ;;  %v594_v25 = vmul.f32 %v593_v5, %v592_v34  ;;  %vm688_vm12 = vweird.f32 %v1418_v4 }
  0xb9   : > { %v926_v12 = vsel %vm910_vm13, %v924_v60, %v889_v6  ;;  %v680_v14 = vxor.u32 2147483648, %v679_v13 }
  0xba   : > { %970 = vst [vmem:[%s1616_s23 + $0x58] sm:$0xff] %v926_v12  ;;  %v690_v51 = vand.u32 3, %v689_v20  ;;  %vm798_vm5 = vcmp.eq.s32.totalorder %v793_v55, 2  ;;  %vm795_vm7 = vcmp.eq.s32.totalorder %v793_v55, 0  ;;  %vm794_vm10 = vcmp.lt.s32.totalorder %v793_v55, 2 }
  0xbb   : > { %v681_v17 = vsel %vm598_vm1, %v680_v14, %v679_v13  ;;  %v928_v1 = vcombine.high %v594_v25, %v594_v25 }
  0xbc   : > { %v684_v50 = vsel %vm597_vm3, %v1418_v4, %v681_v17  ;;  %vm695_vm4 = vcmp.eq.s32.totalorder %v690_v51, 2  ;;  %vm692_vm6 = vcmp.eq.s32.totalorder %v690_v51, 0  ;;  %vm691_vm9 = vcmp.lt.s32.totalorder %v690_v51, 2 }
  0xbd   : > { %1188 = vcosq.f32 %v684_v50 }
  0xbe   : > { %1190 = vsinq.f32 %v684_v50 }
  0xc7   : > { %v1189_v21 = vpop.eup %1188 }
  0xc8   : > { %v1191_v22 = vpop.eup %1190  ;;  %v696_v61 = vxor.u32 2147483648, %v1189_v21 }
  0xc9   : > { %v693_v10 = vxor.u32 2147483648, %v1191_v22 }
  0xca   : > { %v697_v27 = vsel %vm695_vm4, %v696_v61, %v1191_v22  ;;  %v800_v58 = vsel %vm798_vm5, %v696_v61, %v1191_v22 }
  0xcb   : > { %v694_v0 = vsel %vm692_vm6, %v1189_v21, %v693_v10  ;;  %v797_v29 = vsel %vm795_vm7, %v1189_v21, %v693_v10 }
  0xcc   : > { %v698_v3 = vsel %vm691_vm9, %v694_v0, %v697_v27  ;;  %v801_v53 = vsel %vm794_vm10, %v797_v29, %v800_v58 }
  0xcd   : > { %v699_v31 = vsel %vm688_vm12, nan, %v698_v3  ;;  %v802_v30 = vsel %vm688_vm12, nan, %v801_v53 }
  0xce   : > { %v932_v33 = vrot.slane %v699_v31, 5  ;;  %v938_v35 = vrot.slane %v802_v30, 2  ;;  %v931_v36 = vcombine.high %v699_v31, %v699_v31  ;;  %v937_v32 = vcombine.high %v802_v30, %v802_v30 }
  0xcf   : > { %v803_v37 = vmul.f32 2.0, %v699_v31  ;;  %v805_v38 = vsub.f32 %v802_v30, %v699_v31  ;;  %v806_v39 = vadd.f32 %v802_v30, %v699_v31 }
  0xd0   : > { %v951_v4 = vsel %vm892_vm8, %v594_v25, %v932_v33  ;;  %v933_v40 = vrot.slane %v931_v36, 5  ;;  %v939_v9 = vrot.slane %v937_v32, 2 }
  0xd1   : > { %v953_v11 = vsel %vm895_vm11, %v951_v4, %v938_v35  ;;  %v804_v15 = vmul.f32 %v803_v37, %v802_v30  ;;  %v807_v28 = vmul.f32 %v806_v39, %v805_v38 }
  0xd2   : > { %971 = vst [vmem:[%s1616_s23 + $0x60] sm:$0xff] %v953_v11  ;;  %v952_v42 = vsel %vm892_vm8, %v928_v1, %v933_v40 }
  0xd3   : > { %v954_v43 = vsel %vm895_vm11, %v952_v42, %v939_v9  ;;  %v944_v44 = vrot.slane %v804_v15, 7  ;;  %v949_v45 = vcombine.low %v807_v28, %v807_v28  ;;  %v943_v18 = vcombine.high %v804_v15, %v804_v15  ;;  %982 = sbr.rel (!%p1776_p9) target bundleno = 247 (0xf7), region = 32 }
  0xd4   : > { %972 = vst [vmem:[%s1616_s23 + $0x68] sm:$0xff] %v954_v43 }
  0xd5   : > { %v955_v24 = vsel %vm898_vm0, %v938_v35, %v944_v44  ;;  %v945_v7 = vrot.slane %v943_v18, 7 }
  0xd6   : > { %v957_v41 = vsel %vm901_vm2, %v955_v24, %v949_v45 }
  0xd7   : > { %973 = vst [vmem:[%s1616_s23 + $0x70] sm:$0x7f] %v957_v41  ;;  %v956_v46 = vsel %vm898_vm0, %v939_v9, %v945_v7 }
  0xd8   : > { %v958_v47 = vsel %vm901_vm2, %v956_v46, %v807_v28 }
  0xd9   : > { %974 = vst [vmem:[%s1616_s23 + $0x78] sm:$0x7f] %v958_v47 }
  0xda   : > { %s1786_s30 = smov (!%p985_p10, %s984_s30), 2 }
  0xdb   : > { %s1704_s2 = sshll.u32 %s1786_s30, 10 }
  0xdc   : > { %s989_s3 = ssub.s32 2048, %s1704_s2 }
  0xdd   : > { %990 = vsyncadd %s976_s25, %s989_s3  ;;  %p1109_p13 = scmp.ne.s32.totalorder %s1704_s2, 0  ;;  %s1117_s17 = sshll.u32 %s1329_s10, 8 }
  0xde   : > { %s1714_s11 = scalar_lea.hbm %s1767_s1, %s1117_s17  ;;  %s1111_s13 = sshll.u32 %s1786_s30, 3 }
  0xdf   : > { %s996_s14 = sshll.u32 %s1616_s23, 4  ;;  %s1295_s20 = smov [#allocation5]   ;;  %s1718_s14 = int_to_ptr.vmem [resolvable:$true] %s996_s14 }
  0xe0   : > { %s1220_s19 = scalar_lea.vmem %s1718_s14, %s1704_s2  ;;  %s1224_s21 = sshll.u32 %s1295_s20, 4  ;;  %s1225_s21 = int_to_ptr.vmem [resolvable:$false] %s1224_s21 }
  0xe1   : > { %p1221_p5 = scmp.ne.s32.totalorder %s1718_s14, %s1220_s19  ;;  %s1226_s10 = scalar_lea.vmem %s1225_s21, 4096 }
  0xe2   : > { %p1227_p12 = scmp.lt.s32.totalorder %s1718_s14, %s1225_s21  ;;  %p1228_p0 = scmp.lt.s32.totalorder %s1226_s10, %s1220_s19 }
  0xe3   : > { %p1222_p7 = pnand %p1221_p5, %p1109_p13 }
  0xe4   : > { %p1229_p1 = por %p1228_p0, %p1227_p12 }
  0xe5   : > { %p1223_p8 = pneg %p1222_p7 }
  0xe7   : > { %p1230_p3 = pnand %p1229_p1, %p1223_p8 }
  0xe9   : > { %1233 = shalt.err (!%p1230_p3)
}
  0xea   : > { %s1234_s22 = scalar_lea.hbm %s1714_s11, %s1704_s2  ;;  %s1238_s28 = scalar_lea.hbm %s1767_s1, 3072 }
  0xeb   : > { %p1235_p11 = scmp.ne.s32.totalorder %s1714_s11, %s1234_s22  ;;  %p1239_p6 = scmp.lt.u32.totalorder %s1714_s11, %s1767_s1 }
  0xec   : > { %p1240_p9 = scmp.lt.u32.totalorder %s1238_s28, %s1234_s22  ;;  %p1242_p5 = scmp.lt.u32.totalorder %s1234_s22, %s1714_s11 }
  0xed   : > { %p1236_p2 = pnand %p1235_p11, %p1109_p13 }
  0xee   : > { %p1241_p10 = por %p1240_p9, %p1239_p6 }
  0xef   : > { %p1237_p4 = pneg %p1236_p2 }
  0xf0   : > { %p1243_p7 = por %p1242_p5, %p1241_p10 }
  0xf2   : > { %p1244_p8 = pnand %p1243_p7, %p1237_p4 }
  0xf4   : > { %1247 = shalt.err (!%p1244_p8)
}
  0xf5   : > { %s1296_s29 = smov 256   ;;  %s1297_s3 = smov 384  }
  0xf6   : > { %1002 = dma.vmem_to_hbm [thread:$0]  (%p1109_p13), %s1718_s14, %s1704_s2, %s1714_s11, %s976_s25, %s1296_s29, %s1297_s3, %s1111_s13  }
  0xf7 PF: > { %s1011_s17 = sand.u32 1, %s1274_s6   ;;  %p1777_p12 = scmp.ne.s32.totalorder %s1772_s18, 0 }
  0xf8   : > { %p1778_p0 = scmp.ge.s32.totalorder %s1286_s9, 2  ;;  %s1012_s4 = scalar_lea.sflag [#allocation4], %s1011_s17 }
  0xfa   : > { %p1135_p1 = pnand %p1778_p0, %p1777_p12 }
  0xfc   : > { %1269 = dma.done.wait (!%p1135_p1), %s1012_s4, 2048  }
  0xfd   : > { %1271 = vsyncadd (!%p1135_p1), %s1012_s4, 4294965248  ;;  %p14_p3 = scmp.ge.s32.totalorder %s1333_s12, 4   ;;  %s1779_s6 = smov %s1278_s7 }
  0xfe   : > { %s1780_s7 = smov %s1282_s8  ;;  %s1781_s8 = smov %s1345_s15 }
  0xff   : > { %s1782_s9 = smov %s1333_s12  ;;  %16 = sbr.rel (!%p14_p3) target bundleno = 5 (0x5), region = 69 }
 0x106   :  { %1017 = vsyncpa [#allocation3], 1 }
 0x107   :  { %1019 = vsyncpa [#allocation3 + $0x1], 1 }
 0x108   :  { %1020 = vsyncpa [#allocation4], 1 }
 0x109   :  { %1022 = vsyncpa [#allocation4 + $0x1], 1 }

</bundles_post_ra>
